<compile_context>
chip_gen: v7x
topology: tpu7x:2x2x1
jax: 0.10.0
libtpu: 0.0.40
codegen_flags: <defaults>
</compile_context>

<pallas_src>
import functools

import jax
import jax.numpy as jnp
from jax import lax
from jax.experimental import pallas as pl
from jax.experimental.pallas import tpu as pltpu


# ----------------------------------------------------------------------------
# Pallas kernel: hoisted input projection + fused-gate LSTM recurrence +
# final linear + masked log-softmax
# ----------------------------------------------------------------------------
def lstm_classifier_kernel(
    x_all_ref,        # (T*Bp, E)   time-major embedded tokens, batch padded
    wx_ref,           # (E, 4H)     fused input weights,  gate order [i | f | g | o]
    wh_ref,           # (H, 4H)     fused hidden weights, gate order [i | f | g | o]
    b_ref,            # (1, 4H)     fused bias (b_ih + b_hh)
    wout_ref,         # (H, Op)     output projection, zero-padded to Op lanes
    bout_ref,         # (1, Op)
    out_ref,          # (Bp, Op)    log-probabilities (padded)
    xproj_ref,        # VMEM scratch (T*Bp, 4H)
    *,
    valid_out: int,
):
    TB, _E = x_all_ref.shape
    H = wh_ref.shape[0]
    Bp, Op = out_ref.shape
    T = TB // Bp

    # ---- input projection hoisted out of the serial recurrence: one big MXU matmul
    xproj_ref[...] = (
        jnp.dot(x_all_ref[...], wx_ref[...], preferred_element_type=jnp.float32)
        + b_ref[...]
    )

    wh = wh_ref[...]

    def step(t, carry):
        h, c = carry
        off = pl.multiple_of(t * Bp, Bp)                 # sublane-aligned slice start
        gx = xproj_ref[pl.ds(off, Bp), :]                # (Bp, 4H) precomputed x-path
        gates = gx + jnp.dot(h, wh, preferred_element_type=jnp.float32)
        # fused activations on the lane-dense (Bp, 4H) block
        s = jax.nn.sigmoid(gates)                        # one EUP pass over the block
        i_g = s[:, 0 * H:1 * H]
        f_g = s[:, 1 * H:2 * H]
        o_g = s[:, 3 * H:4 * H]
        g_g = jnp.tanh(gates[:, 2 * H:3 * H])
        c_new = f_g * c + i_g * g_g
        h_new = o_g * jnp.tanh(c_new)
        return (h_new, c_new)

    h0 = jnp.zeros((Bp, H), jnp.float32)
    c0 = jnp.zeros((Bp, H), jnp.float32)
    h_final, _ = lax.fori_loop(0, T, step, (h0, c0), unroll=True)

    # ---- hidden_to_out + numerically stable log-softmax over the real O columns
    logits = (
        jnp.dot(h_final, wout_ref[...], preferred_element_type=jnp.float32)
        + bout_ref[...]
    )
    col = lax.broadcasted_iota(jnp.int32, (Bp, Op), 1)
    logits = jnp.where(col < valid_out, logits, jnp.float32(-jnp.inf))
    m = jnp.max(logits, axis=1, keepdims=True)
    z = logits - m
    lse = jnp.log(jnp.sum(jnp.exp(z), axis=1, keepdims=True))
    out_ref[...] = (z - lse).astype(out_ref.dtype)


# ----------------------------------------------------------------------------
# Wrapper: embedding gather, weight fusion, padding, pallas_call
# ----------------------------------------------------------------------------
def _round_up(n, m):
    return (n + m - 1) // m * m


def lm_classifier_rnn_forward(x, params):
    """x: (B, T) int32 token indices. Returns (B, out_size) log-probs."""
    emb_table = params["embedding"]            # (V, E)
    w_ih = params["w_ih"]                      # (4H, E)  gate order: i, f, g, o
    w_hh = params["w_hh"]                      # (4H, H)
    b_ih = params["b_ih"]                      # (4H,)
    b_hh = params["b_hh"]                      # (4H,)
    w_out = params["w_out"]                    # (O, H)
    b_out = params["b_out"]                    # (O,)

    B, T = x.shape
    E = emb_table.shape[1]
    H = w_hh.shape[1]
    O = w_out.shape[0]

    Bp = _round_up(B, 8)       # sublane-aligned batch
    Op = _round_up(O, 128)     # lane-dense logits / output

    # glue: embedding lookup (gather), pad batch, time-major flatten to (T*Bp, E)
    # (jnp.take clamps out-of-range indices; nn.Embedding would raise instead)
    embedded = jnp.take(emb_table, x, axis=0).astype(jnp.float32)   # (B, T, E)
    embedded = jnp.pad(embedded, ((0, Bp - B), (0, 0), (0, 0)))     # (Bp, T, E)
    x_all = jnp.transpose(embedded, (1, 0, 2)).reshape(T * Bp, E)   # (T*Bp, E)

    # glue: fused weights in PyTorch gate order (i, f, g, o)
    wx = jnp.asarray(w_ih.T, jnp.float32)                 # (E, 4H)
    wh = jnp.asarray(w_hh.T, jnp.float32)                 # (H, 4H)
    b = (b_ih + b_hh).reshape(1, 4 * H).astype(jnp.float32)

    wout = jnp.zeros((H, Op), jnp.float32).at[:, :O].set(w_out.T)
    bout = jnp.zeros((1, Op), jnp.float32).at[:, :O].set(b_out.reshape(1, O))

    vmem = pl.BlockSpec(memory_space=pltpu.MemorySpace.VMEM)

    out_padded = pl.pallas_call(
        functools.partial(lstm_classifier_kernel, valid_out=O),
        out_shape=jax.ShapeDtypeStruct((Bp, Op), jnp.float32),
        in_specs=[vmem] * 6,
        out_specs=vmem,
        scratch_shapes=[pltpu.VMEM((T * Bp, 4 * H), jnp.float32)],
        compiler_params=pltpu.CompilerParams(vmem_limit_bytes=64 * 1024 * 1024),
    )(x_all, wx, wh, b, wout, bout)

    return out_padded[:B, :O]


# ----------------------------------------------------------------------------
# Deterministic parameter init (mirrors LMClassifierRNN.__init__ shapes)
# ----------------------------------------------------------------------------
def init_params(key, embedding_size, hidden_size, vocab_size, out_size):
    k_emb, k_ih, k_hh, k_wout, k_bout = jax.random.split(key, 5)
    E, H, V, O = embedding_size, hidden_size, vocab_size, out_size

    def xavier_uniform(k, shape):
        fan_out, fan_in = shape
        bound = jnp.sqrt(6.0 / (fan_in + fan_out))
        return jax.random.uniform(k, shape, jnp.float32, -bound, bound)

    lin_bound = 1.0 / jnp.sqrt(jnp.float32(H))
    return {
        # nn.Embedding default: N(0, 1)
        "embedding": jax.random.normal(k_emb, (V, E), jnp.float32),
        # LSTM weights: xavier_uniform_, biases zero (per init_weights)
        "w_ih": xavier_uniform(k_ih, (4 * H, E)),
        "w_hh": xavier_uniform(k_hh, (4 * H, H)),
        "b_ih": jnp.zeros((4 * H,), jnp.float32),
        "b_hh": jnp.zeros((4 * H,), jnp.float32),
        # nn.Linear default: U(-1/sqrt(H), 1/sqrt(H))
        "w_out": jax.random.uniform(k_wout, (O, H), jnp.float32, -lin_bound, lin_bound),
        "b_out": jax.random.uniform(k_bout, (O,), jnp.float32, -lin_bound, lin_bound),
    }


# ----------------------------------------------------------------------------
# Pure-JAX reference (same math) for a correctness check
# ----------------------------------------------------------------------------
def reference_forward(x, params):
    emb = jnp.take(params["embedding"], x, axis=0)   # (B, T, E)
    B, T, _ = emb.shape
    H = params["w_hh"].shape[1]
    w_ih, w_hh = params["w_ih"], params["w_hh"]
    b = params["b_ih"] + params["b_hh"]

    def step(carry, x_t):
        h, c = carry
        gates = x_t @ w_ih.T + h @ w_hh.T + b
        i, f, g, o = jnp.split(gates, 4, axis=-1)
        i, f, o = jax.nn.sigmoid(i), jax.nn.sigmoid(f), jax.nn.sigmoid(o)
        g = jnp.tanh(g)
        c = f * c + i * g
        h = o * jnp.tanh(c)
        return (h, c), None

    (h, _c), _ = lax.scan(step, (jnp.zeros((B, H)), jnp.zeros((B, H))),
                          jnp.transpose(emb, (1, 0, 2)))
    logits = h @ params["w_out"].T + params["b_out"]
    return jax.nn.log_softmax(logits, axis=1)


if __name__ == "__main__":
    batch, seq_len = 2, 8
    embedding_size, hidden_size, vocab_size, out_size = 16, 32, 30, 2

    key = jax.random.PRNGKey(0)
    k_params, k_x = jax.random.split(key)
    params = init_params(k_params, embedding_size, hidden_size, vocab_size, out_size)
    x = jax.random.randint(k_x, (batch, seq_len), 0, vocab_size, dtype=jnp.int32)

    out = lm_classifier_rnn_forward(x, params)
    out = jax.block_until_ready(out)

    ref = jax.block_until_ready(reference_forward(x, params))
    assert out.shape == (batch, out_size)
    assert jnp.allclose(out, ref, atol=1e-4, rtol=1e-4), (out, ref)

    print("KERNEL_OK")
</pallas_src>

<mosaic_0001>
module attributes {stable_mosaic.version = 11 : i64} {
  func.func @lstm_classifier_kernel(%arg0: memref<64x16xf32, #tpu.memory_space<vmem>>, %arg1: memref<16x128xf32, #tpu.memory_space<vmem>>, %arg2: memref<32x128xf32, #tpu.memory_space<vmem>>, %arg3: memref<1x128xf32, #tpu.memory_space<vmem>>, %arg4: memref<32x128xf32, #tpu.memory_space<vmem>>, %arg5: memref<1x128xf32, #tpu.memory_space<vmem>>, %arg6: memref<8x128xf32, #tpu.memory_space<vmem>>, %arg7: memref<64x128xf32, #tpu.memory_space<vmem>>) attributes {dimension_semantics = [], scalar_prefetch = 0 : i64, scratch_operands = 1 : i64, tpu.core_type = #tpu.core_type<tc>} {
    %c0 = arith.constant 0 : index
    %c0_0 = arith.constant 0 : index
    %0 = vector.load %arg0[%c0, %c0_0] : memref<64x16xf32, #tpu.memory_space<vmem>>, vector<64x16xf32>
    %c0_1 = arith.constant 0 : index
    %c0_2 = arith.constant 0 : index
    %1 = vector.load %arg1[%c0_1, %c0_2] : memref<16x128xf32, #tpu.memory_space<vmem>>, vector<16x128xf32>
    %cst = arith.constant dense<0.000000e+00> : vector<64x128xf32>
    %2 = tpu.matmul %0, %1, %cst {dimension_numbers = #tpu.dot_dimension_numbers<[1], [0], [0], [1], [0, 0, 1, 1], [], []>} : vector<64x16xf32>, vector<16x128xf32>, vector<64x128xf32> -> vector<64x128xf32>
    %c0_3 = arith.constant 0 : index
    %c0_4 = arith.constant 0 : index
    %3 = vector.load %arg3[%c0_3, %c0_4] : memref<1x128xf32, #tpu.memory_space<vmem>>, vector<1x128xf32>
    %4 = vector.broadcast %3 : vector<1x128xf32> to vector<64x128xf32>
    %5 = arith.addf %2, %4 : vector<64x128xf32>
    %c0_5 = arith.constant 0 : index
    %c0_6 = arith.constant 0 : index
    %6 = vector.load %arg7[%c0_5, %c0_6] : memref<64x128xf32, #tpu.memory_space<vmem>>, vector<64x128xf32>
    tpu.vector_store %arg7[%c0_5, %c0_6], %5 {strides = array<i32>} : memref<64x128xf32, #tpu.memory_space<vmem>>, vector<64x128xf32>,
    %c0_7 = arith.constant 0 : index
    %c0_8 = arith.constant 0 : index
    %7 = vector.load %arg2[%c0_7, %c0_8] : memref<32x128xf32, #tpu.memory_space<vmem>>, vector<32x128xf32>
    %cst_9 = arith.constant 0.000000e+00 : f32
    %8 = vector.broadcast %cst_9 : f32 to vector<8x32xf32>
    %cst_10 = arith.constant 0.000000e+00 : f32
    %9 = vector.broadcast %cst_10 : f32 to vector<8x32xf32>
    %c0_i32 = arith.constant 0 : i32
    %c8_i32 = arith.constant 8 : i32
    %10 = arith.muli %c0_i32, %c8_i32 : i32
    %11 = tpu.assume_multiple %10, 8 : i32
    %12 = arith.index_cast %11 : i32 to index
    %c0_11 = arith.constant 0 : index
    %13 = vector.load %arg7[%12, %c0_11] : memref<64x128xf32, #tpu.memory_space<vmem>>, vector<8x128xf32>
    %cst_12 = arith.constant dense<0.000000e+00> : vector<8x128xf32>
    %14 = tpu.matmul %8, %7, %cst_12 {dimension_numbers = #tpu.dot_dimension_numbers<[1], [0], [0], [1], [0, 0, 1, 1], [], []>} : vector<8x32xf32>, vector<32x128xf32>, vector<8x128xf32> -> vector<8x128xf32>
    %15 = arith.addf %13, %14 : vector<8x128xf32>
    %16 = arith.negf %15 : vector<8x128xf32>
    %17 = math.exp %16 : vector<8x128xf32>
    %cst_13 = arith.constant 1.000000e+00 : f32
    %18 = vector.broadcast %cst_13 : f32 to vector<8x128xf32>
    %19 = arith.addf %18, %17 : vector<8x128xf32>
    %20 = arith.divf %18, %19 : vector<8x128xf32>
    %21 = vector.extract_strided_slice %20 {offsets = [0, 0], sizes = [8, 32], strides = [1, 1]} : vector<8x128xf32> to vector<8x32xf32>
    %22 = vector.extract_strided_slice %20 {offsets = [0, 32], sizes = [8, 32], strides = [1, 1]} : vector<8x128xf32> to vector<8x32xf32>
    %23 = vector.extract_strided_slice %20 {offsets = [0, 96], sizes = [8, 32], strides = [1, 1]} : vector<8x128xf32> to vector<8x32xf32>
    %24 = vector.extract_strided_slice %15 {offsets = [0, 64], sizes = [8, 32], strides = [1, 1]} : vector<8x128xf32> to vector<8x32xf32>
    %25 = math.tanh %24 : vector<8x32xf32>
    %26 = arith.mulf %22, %9 : vector<8x32xf32>
    %27 = arith.mulf %21, %25 : vector<8x32xf32>
    %28 = arith.addf %26, %27 : vector<8x32xf32>
    %29 = math.tanh %28 : vector<8x32xf32>
    %30 = arith.mulf %23, %29 : vector<8x32xf32>
    %c1_i32 = arith.constant 1 : i32
    %c8_i32_14 = arith.constant 8 : i32
    %31 = arith.muli %c1_i32, %c8_i32_14 : i32
    %32 = tpu.assume_multiple %31, 8 : i32
    %33 = arith.index_cast %32 : i32 to index
    %c0_15 = arith.constant 0 : index
    %34 = vector.load %arg7[%33, %c0_15] : memref<64x128xf32, #tpu.memory_space<vmem>>, vector<8x128xf32>
    %cst_16 = arith.constant dense<0.000000e+00> : vector<8x128xf32>
    %35 = tpu.matmul %30, %7, %cst_16 {dimension_numbers = #tpu.dot_dimension_numbers<[1], [0], [0], [1], [0, 0, 1, 1], [], []>} : vector<8x32xf32>, vector<32x128xf32>, vector<8x128xf32> -> vector<8x128xf32>
    %36 = arith.addf %34, %35 : vector<8x128xf32>
    %37 = arith.negf %36 : vector<8x128xf32>
    %38 = math.exp %37 : vector<8x128xf32>
    %cst_17 = arith.constant 1.000000e+00 : f32
    %39 = vector.broadcast %cst_17 : f32 to vector<8x128xf32>
    %40 = arith.addf %39, %38 : vector<8x128xf32>
    %41 = arith.divf %39, %40 : vector<8x128xf32>
    %42 = vector.extract_strided_slice %41 {offsets = [0, 0], sizes = [8, 32], strides = [1, 1]} : vector<8x128xf32> to vector<8x32xf32>
    %43 = vector.extract_strided_slice %41 {offsets = [0, 32], sizes = [8, 32], strides = [1, 1]} : vector<8x128xf32> to vector<8x32xf32>
    %44 = vector.extract_strided_slice %41 {offsets = [0, 96], sizes = [8, 32], strides = [1, 1]} : vector<8x128xf32> to vector<8x32xf32>
    %45 = vector.extract_strided_slice %36 {offsets = [0, 64], sizes = [8, 32], strides = [1, 1]} : vector<8x128xf32> to vector<8x32xf32>
    %46 = math.tanh %45 : vector<8x32xf32>
    %47 = arith.mulf %43, %28 : vector<8x32xf32>
    %48 = arith.mulf %42, %46 : vector<8x32xf32>
    %49 = arith.addf %47, %48 : vector<8x32xf32>
    %50 = math.tanh %49 : vector<8x32xf32>
    %51 = arith.mulf %44, %50 : vector<8x32xf32>
    %c2_i32 = arith.constant 2 : i32
    %c8_i32_18 = arith.constant 8 : i32
    %52 = arith.muli %c2_i32, %c8_i32_18 : i32
    %53 = tpu.assume_multiple %52, 8 : i32
    %54 = arith.index_cast %53 : i32 to index
    %c0_19 = arith.constant 0 : index
    %55 = vector.load %arg7[%54, %c0_19] : memref<64x128xf32, #tpu.memory_space<vmem>>, vector<8x128xf32>
    %cst_20 = arith.constant dense<0.000000e+00> : vector<8x128xf32>
    %56 = tpu.matmul %51, %7, %cst_20 {dimension_numbers = #tpu.dot_dimension_numbers<[1], [0], [0], [1], [0, 0, 1, 1], [], []>} : vector<8x32xf32>, vector<32x128xf32>, vector<8x128xf32> -> vector<8x128xf32>
    %57 = arith.addf %55, %56 : vector<8x128xf32>
    %58 = arith.negf %57 : vector<8x128xf32>
    %59 = math.exp %58 : vector<8x128xf32>
    %cst_21 = arith.constant 1.000000e+00 : f32
    %60 = vector.broadcast %cst_21 : f32 to vector<8x128xf32>
    %61 = arith.addf %60, %59 : vector<8x128xf32>
    %62 = arith.divf %60, %61 : vector<8x128xf32>
    %63 = vector.extract_strided_slice %62 {offsets = [0, 0], sizes = [8, 32], strides = [1, 1]} : vector<8x128xf32> to vector<8x32xf32>
    %64 = vector.extract_strided_slice %62 {offsets = [0, 32], sizes = [8, 32], strides = [1, 1]} : vector<8x128xf32> to vector<8x32xf32>
    %65 = vector.extract_strided_slice %62 {offsets = [0, 96], sizes = [8, 32], strides = [1, 1]} : vector<8x128xf32> to vector<8x32xf32>
    %66 = vector.extract_strided_slice %57 {offsets = [0, 64], sizes = [8, 32], strides = [1, 1]} : vector<8x128xf32> to vector<8x32xf32>
    %67 = math.tanh %66 : vector<8x32xf32>
    %68 = arith.mulf %64, %49 : vector<8x32xf32>
    %69 = arith.mulf %63, %67 : vector<8x32xf32>
    %70 = arith.addf %68, %69 : vector<8x32xf32>
    %71 = math.tanh %70 : vector<8x32xf32>
    %72 = arith.mulf %65, %71 : vector<8x32xf32>
    %c3_i32 = arith.constant 3 : i32
    %c8_i32_22 = arith.constant 8 : i32
    %73 = arith.muli %c3_i32, %c8_i32_22 : i32
    %74 = tpu.assume_multiple %73, 8 : i32
    %75 = arith.index_cast %74 : i32 to index
    %c0_23 = arith.constant 0 : index
    %76 = vector.load %arg7[%75, %c0_23] : memref<64x128xf32, #tpu.memory_space<vmem>>, vector<8x128xf32>
    %cst_24 = arith.constant dense<0.000000e+00> : vector<8x128xf32>
    %77 = tpu.matmul %72, %7, %cst_24 {dimension_numbers = #tpu.dot_dimension_numbers<[1], [0], [0], [1], [0, 0, 1, 1], [], []>} : vector<8x32xf32>, vector<32x128xf32>, vector<8x128xf32> -> vector<8x128xf32>
    %78 = arith.addf %76, %77 : vector<8x128xf32>
    %79 = arith.negf %78 : vector<8x128xf32>
    %80 = math.exp %79 : vector<8x128xf32>
    %cst_25 = arith.constant 1.000000e+00 : f32
    %81 = vector.broadcast %cst_25 : f32 to vector<8x128xf32>
    %82 = arith.addf %81, %80 : vector<8x128xf32>
    %83 = arith.divf %81, %82 : vector<8x128xf32>
    %84 = vector.extract_strided_slice %83 {offsets = [0, 0], sizes = [8, 32], strides = [1, 1]} : vector<8x128xf32> to vector<8x32xf32>
    %85 = vector.extract_strided_slice %83 {offsets = [0, 32], sizes = [8, 32], strides = [1, 1]} : vector<8x128xf32> to vector<8x32xf32>
    %86 = vector.extract_strided_slice %83 {offsets = [0, 96], sizes = [8, 32], strides = [1, 1]} : vector<8x128xf32> to vector<8x32xf32>
    %87 = vector.extract_strided_slice %78 {offsets = [0, 64], sizes = [8, 32], strides = [1, 1]} : vector<8x128xf32> to vector<8x32xf32>
    %88 = math.tanh %87 : vector<8x32xf32>
    %89 = arith.mulf %85, %70 : vector<8x32xf32>
    %90 = arith.mulf %84, %88 : vector<8x32xf32>
    %91 = arith.addf %89, %90 : vector<8x32xf32>
    %92 = math.tanh %91 : vector<8x32xf32>
    %93 = arith.mulf %86, %92 : vector<8x32xf32>
    %c4_i32 = arith.constant 4 : i32
    %c8_i32_26 = arith.constant 8 : i32
    %94 = arith.muli %c4_i32, %c8_i32_26 : i32
    %95 = tpu.assume_multiple %94, 8 : i32
    %96 = arith.index_cast %95 : i32 to index
    %c0_27 = arith.constant 0 : index
    %97 = vector.load %arg7[%96, %c0_27] : memref<64x128xf32, #tpu.memory_space<vmem>>, vector<8x128xf32>
    %cst_28 = arith.constant dense<0.000000e+00> : vector<8x128xf32>
    %98 = tpu.matmul %93, %7, %cst_28 {dimension_numbers = #tpu.dot_dimension_numbers<[1], [0], [0], [1], [0, 0, 1, 1], [], []>} : vector<8x32xf32>, vector<32x128xf32>, vector<8x128xf32> -> vector<8x128xf32>
    %99 = arith.addf %97, %98 : vector<8x128xf32>
    %100 = arith.negf %99 : vector<8x128xf32>
    %101 = math.exp %100 : vector<8x128xf32>
    %cst_29 = arith.constant 1.000000e+00 : f32
    %102 = vector.broadcast %cst_29 : f32 to vector<8x128xf32>
    %103 = arith.addf %102, %101 : vector<8x128xf32>
    %104 = arith.divf %102, %103 : vector<8x128xf32>
    %105 = vector.extract_strided_slice %104 {offsets = [0, 0], sizes = [8, 32], strides = [1, 1]} : vector<8x128xf32> to vector<8x32xf32>
    %106 = vector.extract_strided_slice %104 {offsets = [0, 32], sizes = [8, 32], strides = [1, 1]} : vector<8x128xf32> to vector<8x32xf32>
    %107 = vector.extract_strided_slice %104 {offsets = [0, 96], sizes = [8, 32], strides = [1, 1]} : vector<8x128xf32> to vector<8x32xf32>
    %108 = vector.extract_strided_slice %99 {offsets = [0, 64], sizes = [8, 32], strides = [1, 1]} : vector<8x128xf32> to vector<8x32xf32>
    %109 = math.tanh %108 : vector<8x32xf32>
    %110 = arith.mulf %106, %91 : vector<8x32xf32>
    %111 = arith.mulf %105, %109 : vector<8x32xf32>
    %112 = arith.addf %110, %111 : vector<8x32xf32>
    %113 = math.tanh %112 : vector<8x32xf32>
    %114 = arith.mulf %107, %113 : vector<8x32xf32>
    %c5_i32 = arith.constant 5 : i32
    %c8_i32_30 = arith.constant 8 : i32
    %115 = arith.muli %c5_i32, %c8_i32_30 : i32
    %116 = tpu.assume_multiple %115, 8 : i32
    %117 = arith.index_cast %116 : i32 to index
    %c0_31 = arith.constant 0 : index
    %118 = vector.load %arg7[%117, %c0_31] : memref<64x128xf32, #tpu.memory_space<vmem>>, vector<8x128xf32>
    %cst_32 = arith.constant dense<0.000000e+00> : vector<8x128xf32>
    %119 = tpu.matmul %114, %7, %cst_32 {dimension_numbers = #tpu.dot_dimension_numbers<[1], [0], [0], [1], [0, 0, 1, 1], [], []>} : vector<8x32xf32>, vector<32x128xf32>, vector<8x128xf32> -> vector<8x128xf32>
    %120 = arith.addf %118, %119 : vector<8x128xf32>
    %121 = arith.negf %120 : vector<8x128xf32>
    %122 = math.exp %121 : vector<8x128xf32>
    %cst_33 = arith.constant 1.000000e+00 : f32
    %123 = vector.broadcast %cst_33 : f32 to vector<8x128xf32>
    %124 = arith.addf %123, %122 : vector<8x128xf32>
    %125 = arith.divf %123, %124 : vector<8x128xf32>
    %126 = vector.extract_strided_slice %125 {offsets = [0, 0], sizes = [8, 32], strides = [1, 1]} : vector<8x128xf32> to vector<8x32xf32>
    %127 = vector.extract_strided_slice %125 {offsets = [0, 32], sizes = [8, 32], strides = [1, 1]} : vector<8x128xf32> to vector<8x32xf32>
    %128 = vector.extract_strided_slice %125 {offsets = [0, 96], sizes = [8, 32], strides = [1, 1]} : vector<8x128xf32> to vector<8x32xf32>
    %129 = vector.extract_strided_slice %120 {offsets = [0, 64], sizes = [8, 32], strides = [1, 1]} : vector<8x128xf32> to vector<8x32xf32>
    %130 = math.tanh %129 : vector<8x32xf32>
    %131 = arith.mulf %127, %112 : vector<8x32xf32>
    %132 = arith.mulf %126, %130 : vector<8x32xf32>
    %133 = arith.addf %131, %132 : vector<8x32xf32>
    %134 = math.tanh %133 : vector<8x32xf32>
    %135 = arith.mulf %128, %134 : vector<8x32xf32>
    %c6_i32 = arith.constant 6 : i32
    %c8_i32_34 = arith.constant 8 : i32
    %136 = arith.muli %c6_i32, %c8_i32_34 : i32
    %137 = tpu.assume_multiple %136, 8 : i32
    %138 = arith.index_cast %137 : i32 to index
    %c0_35 = arith.constant 0 : index
    %139 = vector.load %arg7[%138, %c0_35] : memref<64x128xf32, #tpu.memory_space<vmem>>, vector<8x128xf32>
    %cst_36 = arith.constant dense<0.000000e+00> : vector<8x128xf32>
    %140 = tpu.matmul %135, %7, %cst_36 {dimension_numbers = #tpu.dot_dimension_numbers<[1], [0], [0], [1], [0, 0, 1, 1], [], []>} : vector<8x32xf32>, vector<32x128xf32>, vector<8x128xf32> -> vector<8x128xf32>
    %141 = arith.addf %139, %140 : vector<8x128xf32>
    %142 = arith.negf %141 : vector<8x128xf32>
    %143 = math.exp %142 : vector<8x128xf32>
    %cst_37 = arith.constant 1.000000e+00 : f32
    %144 = vector.broadcast %cst_37 : f32 to vector<8x128xf32>
    %145 = arith.addf %144, %143 : vector<8x128xf32>
    %146 = arith.divf %144, %145 : vector<8x128xf32>
    %147 = vector.extract_strided_slice %146 {offsets = [0, 0], sizes = [8, 32], strides = [1, 1]} : vector<8x128xf32> to vector<8x32xf32>
    %148 = vector.extract_strided_slice %146 {offsets = [0, 32], sizes = [8, 32], strides = [1, 1]} : vector<8x128xf32> to vector<8x32xf32>
    %149 = vector.extract_strided_slice %146 {offsets = [0, 96], sizes = [8, 32], strides = [1, 1]} : vector<8x128xf32> to vector<8x32xf32>
    %150 = vector.extract_strided_slice %141 {offsets = [0, 64], sizes = [8, 32], strides = [1, 1]} : vector<8x128xf32> to vector<8x32xf32>
    %151 = math.tanh %150 : vector<8x32xf32>
    %152 = arith.mulf %148, %133 : vector<8x32xf32>
    %153 = arith.mulf %147, %151 : vector<8x32xf32>
    %154 = arith.addf %152, %153 : vector<8x32xf32>
    %155 = math.tanh %154 : vector<8x32xf32>
    %156 = arith.mulf %149, %155 : vector<8x32xf32>
    %c7_i32 = arith.constant 7 : i32
    %c8_i32_38 = arith.constant 8 : i32
    %157 = arith.muli %c7_i32, %c8_i32_38 : i32
    %158 = tpu.assume_multiple %157, 8 : i32
    %159 = arith.index_cast %158 : i32 to index
    %c0_39 = arith.constant 0 : index
    %160 = vector.load %arg7[%159, %c0_39] : memref<64x128xf32, #tpu.memory_space<vmem>>, vector<8x128xf32>
    %cst_40 = arith.constant dense<0.000000e+00> : vector<8x128xf32>
    %161 = tpu.matmul %156, %7, %cst_40 {dimension_numbers = #tpu.dot_dimension_numbers<[1], [0], [0], [1], [0, 0, 1, 1], [], []>} : vector<8x32xf32>, vector<32x128xf32>, vector<8x128xf32> -> vector<8x128xf32>
    %162 = arith.addf %160, %161 : vector<8x128xf32>
    %163 = arith.negf %162 : vector<8x128xf32>
    %164 = math.exp %163 : vector<8x128xf32>
    %cst_41 = arith.constant 1.000000e+00 : f32
    %165 = vector.broadcast %cst_41 : f32 to vector<8x128xf32>
    %166 = arith.addf %165, %164 : vector<8x128xf32>
    %167 = arith.divf %165, %166 : vector<8x128xf32>
    %168 = vector.extract_strided_slice %167 {offsets = [0, 0], sizes = [8, 32], strides = [1, 1]} : vector<8x128xf32> to vector<8x32xf32>
    %169 = vector.extract_strided_slice %167 {offsets = [0, 32], sizes = [8, 32], strides = [1, 1]} : vector<8x128xf32> to vector<8x32xf32>
    %170 = vector.extract_strided_slice %167 {offsets = [0, 96], sizes = [8, 32], strides = [1, 1]} : vector<8x128xf32> to vector<8x32xf32>
    %171 = vector.extract_strided_slice %162 {offsets = [0, 64], sizes = [8, 32], strides = [1, 1]} : vector<8x128xf32> to vector<8x32xf32>
    %172 = math.tanh %171 : vector<8x32xf32>
    %173 = arith.mulf %169, %154 : vector<8x32xf32>
    %174 = arith.mulf %168, %172 : vector<8x32xf32>
    %175 = arith.addf %173, %174 : vector<8x32xf32>
    %176 = math.tanh %175 : vector<8x32xf32>
    %177 = arith.mulf %170, %176 : vector<8x32xf32>
    %c8_i32_42 = arith.constant 8 : i32
    %c0_43 = arith.constant 0 : index
    %c0_44 = arith.constant 0 : index
    %178 = vector.load %arg4[%c0_43, %c0_44] : memref<32x128xf32, #tpu.memory_space<vmem>>, vector<32x128xf32>
    %cst_45 = arith.constant dense<0.000000e+00> : vector<8x128xf32>
    %179 = tpu.matmul %177, %178, %cst_45 {dimension_numbers = #tpu.dot_dimension_numbers<[1], [0], [0], [1], [0, 0, 1, 1], [], []>} : vector<8x32xf32>, vector<32x128xf32>, vector<8x128xf32> -> vector<8x128xf32>
    %c0_46 = arith.constant 0 : index
    %c0_47 = arith.constant 0 : index
    %180 = vector.load %arg5[%c0_46, %c0_47] : memref<1x128xf32, #tpu.memory_space<vmem>>, vector<1x128xf32>
    %181 = vector.broadcast %180 : vector<1x128xf32> to vector<8x128xf32>
    %182 = arith.addf %179, %181 : vector<8x128xf32>
    %183 = tpu.iota {dimensions = array<i32: 1>} : vector<8x128xi32>
    %c2_i32_48 = arith.constant 2 : i32
    %184 = vector.broadcast %c2_i32_48 : i32 to vector<8x128xi32>
    %185 = arith.cmpi slt, %183, %184 : vector<8x128xi32>
    %cst_49 = arith.constant 0xFF800000 : f32
    %186 = vector.broadcast %cst_49 : f32 to vector<8x128xf32>
    %187 = arith.select %185, %182, %186 : vector<8x128xi1>, vector<8x128xf32>
    %cst_50 = arith.constant dense<0xFF800000> : vector<8xf32>
    %188 = vector.multi_reduction <maximumf>, %187, %cst_50 [1] : vector<8x128xf32> to vector<8xf32>
    %189 = vector.shape_cast %188 : vector<8xf32> to vector<8x1xf32>
    %190 = vector.broadcast %189 : vector<8x1xf32> to vector<8x128xf32>
    %191 = arith.subf %187, %190 : vector<8x128xf32>
    %192 = math.exp %191 : vector<8x128xf32>
    %cst_51 = arith.constant dense<0.000000e+00> : vector<8xf32>
    %193 = vector.multi_reduction <add>, %192, %cst_51 [1] : vector<8x128xf32> to vector<8xf32>
    %194 = vector.shape_cast %193 : vector<8xf32> to vector<8x1xf32>
    %195 = math.log %194 : vector<8x1xf32>
    %196 = vector.broadcast %195 : vector<8x1xf32> to vector<8x128xf32>
    %197 = arith.subf %191, %196 : vector<8x128xf32>
    %c0_52 = arith.constant 0 : index
    %c0_53 = arith.constant 0 : index
    %198 = vector.load %arg6[%c0_52, %c0_53] : memref<8x128xf32, #tpu.memory_space<vmem>>, vector<8x128xf32>
    tpu.vector_store %arg6[%c0_52, %c0_53], %197 {strides = array<i32>} : memref<8x128xf32, #tpu.memory_space<vmem>>, vector<8x128xf32>,
    return
  }
}

</mosaic_0001>

<bundles_post_ra>
// kernel: tpu_custom_call.1
= control target key start
LH: loop header
LB: loop body
LE: loop exit
PB: predicated region body
PF: predicated region fallthrough
CT: control target
= control target key end

     0   :  { %11 = vsyncpa [#allocation4], 0  ;;  %s1981_s0 = inlined_call_operand.hbm [shape: f32[64,16], index: 0, kind: input, shape index: {}]   ;;  %s1982_s1 = inlined_call_operand.hbm [shape: f32[16,128], index: 1, kind: input, shape index: {}]   ;;  %s1983_s2 = inlined_call_operand.hbm [shape: f32[32,128], index: 2, kind: input, shape index: {}]   ;;  %s1984_s3 = inlined_call_operand.hbm [shape: f32[1,128], index: 3, kind: input, shape index: {}]   ;;  %s1985_s4 = inlined_call_operand.hbm [shape: f32[32,128], index: 4, kind: input, shape index: {}]   ;;  %s1986_s5 = inlined_call_operand.hbm [shape: f32[1,128], index: 5, kind: input, shape index: {}]   ;;  %s1987_s6 = inlined_call_operand.hbm [shape: f32[8,128], index: 6, kind: output, shape index: {}]  }
   0x1   :  { %12 = vsyncpa [#allocation7], 0 }
   0x2   :  { %13 = vsyncpa [#allocation10], 0 }
   0x3   :  { %14 = vsyncpa [#allocation13], 0 }
   0x4   :  { %15 = vsyncpa [#allocation5], 0  ;;  %s1694_s21 = smov [#allocation6]   ;;  %s1695_s23 = smov [#allocation9]  }
   0x5   :  { %s33_s22 = sshll.u32 %s1694_s21, 4  ;;  %s58_s24 = sshll.u32 %s1695_s23, 4  ;;  %s34_s22 = int_to_ptr.vmem [resolvable:$true] %s33_s22  ;;  %s1743_s24 = int_to_ptr.vmem [resolvable:$true] %s58_s24 }
   0x6   :  { %s1530_s27 = scalar_lea.hbm %s1982_s1, 256 }
   0x7   :  { %p1531_p0 = scmp.ne.s32.totalorder %s1982_s1, %s1530_s27  ;;  %p1534_p1 = scmp.lt.u32.totalorder %s1530_s27, %s1982_s1 }
   0x9   :  { %p1536_p2 = pnand %p1534_p1, %p1531_p0 }
   0xb   :  { %1539 = shalt.err (!%p1536_p2)
}
   0xc   :  { %s1540_s8 = scalar_lea.vmem %s34_s22, 256  ;;  %p1545_p4 = scmp.lt.s32.totalorder %s34_s22, %s34_s22 }
   0xd   :  { %p1541_p3 = scmp.ne.s32.totalorder %s34_s22, %s1540_s8  ;;  %p1546_p5 = scmp.lt.s32.totalorder %s1540_s8, %s1540_s8 }
   0xf   :  { %p1547_p6 = por %p1546_p5, %p1545_p4 }
  0x11   :  { %p1548_p7 = pnand %p1547_p6, %p1541_p3 }
  0x13   :  { %1551 = shalt.err (!%p1548_p7)
}
  0x14   :  { %s1696_s9 = smov 128   ;;  %s1697_s10 = smov 8  }
  0x15   :  { %39 = dma.hbm_to_vmem [thread:$0]  %s1982_s1, 256, %s34_s22, [#allocation7], %s1696_s9, %s1696_s9, %s1697_s10  }
  0x16   :  { %s1552_s15 = scalar_lea.hbm %s1984_s3, 16 }
  0x17   :  { %p1553_p8 = scmp.ne.s32.totalorder %s1984_s3, %s1552_s15  ;;  %p1556_p9 = scmp.lt.u32.totalorder %s1552_s15, %s1984_s3 }
  0x19   :  { %p1558_p10 = pnand %p1556_p9, %p1553_p8 }
  0x1b   :  { %1561 = shalt.err (!%p1558_p10)
}
  0x1c   :  { %s1562_s20 = scalar_lea.vmem %s1743_s24, 16  ;;  %s1566_s1 = scalar_lea.vmem %s1743_s24, 32 }
  0x1d   :  { %p1563_p11 = scmp.ne.s32.totalorder %s1743_s24, %s1562_s20  ;;  %p1567_p12 = scmp.lt.s32.totalorder %s1743_s24, %s1743_s24 }
  0x1e   :  { %p1568_p13 = scmp.lt.s32.totalorder %s1566_s1, %s1562_s20 }
  0x20   :  { %p1569_p0 = por %p1568_p13, %p1567_p12 }
  0x22   :  { %p1570_p1 = pnand %p1569_p0, %p1563_p11 }
  0x24   :  { %1573 = shalt.err (!%p1570_p1)
}
  0x25   :  { %61 = dma.hbm_to_vmem [thread:$0]  %s1984_s3, 16, %s1743_s24, [#allocation10]  }
  0x26   :  { %s1698_s23 = smov [#allocation3]   ;;  %s1699_s26 = smov [#allocation8]  }
  0x27   :  { %s21_s25 = sshll.u32 %s1698_s23, 4  ;;  %s45_s27 = sshll.u32 %s1699_s26, 4  ;;  %s22_s25 = int_to_ptr.vmem [resolvable:$true] %s21_s25  ;;  %s1778_s27 = int_to_ptr.vmem [resolvable:$true] %s45_s27 }
  0x28   :  { %s1574_s30 = scalar_lea.hbm %s1981_s0, 1024 }
  0x29   :  { %p1575_p2 = scmp.ne.s32.totalorder %s1981_s0, %s1574_s30  ;;  %p1578_p3 = scmp.lt.u32.totalorder %s1574_s30, %s1981_s0 }
  0x2b   :  { %p1580_p4 = pnand %p1578_p3, %p1575_p2 }
  0x2d   :  { %1583 = shalt.err (!%p1580_p4)
}
  0x2e   :  { %s1584_s3 = scalar_lea.vmem %s22_s25, 1024  ;;  %p1589_p6 = scmp.lt.s32.totalorder %s22_s25, %s22_s25 }
  0x2f   :  { %p1585_p5 = scmp.ne.s32.totalorder %s22_s25, %s1584_s3  ;;  %p1590_p7 = scmp.lt.s32.totalorder %s1584_s3, %s1584_s3 }
  0x31   :  { %p1591_p8 = por %p1590_p7, %p1589_p6 }
  0x33   :  { %p1592_p9 = pnand %p1591_p8, %p1585_p5 }
  0x35   :  { %1595 = shalt.err (!%p1592_p9)
}
  0x36   :  { %27 = dma.hbm_to_vmem [thread:$0]  %s1981_s0, 1024, %s22_s25, [#allocation4], %s1696_s9, %s1696_s9, %s1697_s10  }
  0x37   :  { %s1596_s16 = scalar_lea.hbm %s1983_s2, 512 }
  0x38   :  { %p1597_p10 = scmp.ne.s32.totalorder %s1983_s2, %s1596_s16  ;;  %p1600_p11 = scmp.lt.u32.totalorder %s1596_s16, %s1983_s2 }
  0x3a   :  { %p1602_p12 = pnand %p1600_p11, %p1597_p10 }
  0x3c   :  { %1605 = shalt.err (!%p1602_p12)
}
  0x3d   :  { %s1606_s1 = scalar_lea.vmem %s1778_s27, 512  ;;  %p1611_p0 = scmp.lt.s32.totalorder %s1778_s27, %s1778_s27 }
  0x3e   :  { %p1607_p13 = scmp.ne.s32.totalorder %s1778_s27, %s1606_s1  ;;  %p1612_p1 = scmp.lt.s32.totalorder %s1606_s1, %s1606_s1 }
  0x40   :  { %p1613_p2 = por %p1612_p1, %p1611_p0 }
  0x42   :  { %p1614_p3 = pnand %p1613_p2, %p1607_p13 }
  0x44   :  { %1617 = shalt.err (!%p1614_p3)
}
  0x45   :  { %51 = dma.hbm_to_vmem [thread:$0]  %s1983_s2, 512, %s1778_s27, [#allocation7], %s1696_s9, %s1696_s9, %s1697_s10  }
  0x46   :  { %s1700_s22 = smov [#allocation11]   ;;  %s1701_s25 = smov [#allocation12]  }
  0x47   :  { %s67_s23 = sshll.u32 %s1700_s22, 4  ;;  %s80_s26 = sshll.u32 %s1701_s25, 4  ;;  %s68_s23 = int_to_ptr.vmem [resolvable:$true] %s67_s23  ;;  %s81_s26 = int_to_ptr.vmem [resolvable:$true] %s80_s26 }
  0x48   :  { %s1618_s30 = scalar_lea.hbm %s1985_s4, 512 }
  0x49   :  { %p1619_p4 = scmp.ne.s32.totalorder %s1985_s4, %s1618_s30  ;;  %p1622_p5 = scmp.lt.u32.totalorder %s1618_s30, %s1985_s4 }
  0x4b   :  { %p1624_p6 = pnand %p1622_p5, %p1619_p4 }
  0x4d   :  { %1627 = shalt.err (!%p1624_p6)
}
  0x4e   :  { %s1628_s2 = scalar_lea.vmem %s68_s23, 512  ;;  %p1633_p8 = scmp.lt.s32.totalorder %s68_s23, %s68_s23 }
  0x4f   :  { %p1629_p7 = scmp.ne.s32.totalorder %s68_s23, %s1628_s2  ;;  %p1634_p9 = scmp.lt.s32.totalorder %s1628_s2, %s1628_s2 }
  0x51   :  { %p1635_p10 = por %p1634_p9, %p1633_p8 }
  0x53   :  { %p1636_p11 = pnand %p1635_p10, %p1629_p7 }
  0x55   :  { %1639 = shalt.err (!%p1636_p11)
}
  0x56   :  { %73 = dma.hbm_to_vmem [thread:$0]  %s1985_s4, 512, %s68_s23, [#allocation10], %s1696_s9, %s1696_s9, %s1697_s10  }
  0x57   :  { %s1640_s14 = scalar_lea.hbm %s1986_s5, 16 }
  0x58   :  { %p1641_p12 = scmp.ne.s32.totalorder %s1986_s5, %s1640_s14  ;;  %p1644_p13 = scmp.lt.u32.totalorder %s1640_s14, %s1986_s5 }
  0x5a   :  { %p1646_p0 = pnand %p1644_p13, %p1641_p12 }
  0x5c   :  { %1649 = shalt.err (!%p1646_p0)
}
  0x5d   :  { %s1650_s19 = scalar_lea.vmem %s81_s26, 16  ;;  %s1654_s20 = scalar_lea.vmem %s81_s26, 32 }
  0x5e   :  { %p1651_p1 = scmp.ne.s32.totalorder %s81_s26, %s1650_s19  ;;  %p1655_p2 = scmp.lt.s32.totalorder %s81_s26, %s81_s26 }
  0x5f   :  { %p1656_p3 = scmp.lt.s32.totalorder %s1654_s20, %s1650_s19 }
  0x61   :  { %p1657_p4 = por %p1656_p3, %p1655_p2 }
  0x63   :  { %p1658_p5 = pnand %p1657_p4, %p1651_p1 }
  0x65   :  { %1661 = shalt.err (!%p1658_p5)
}
  0x66   :  { %83 = dma.hbm_to_vmem [thread:$0]  %s1986_s5, 16, %s81_s26, [#allocation13]  }
  0x67   :  { %1684 = dma.done.wait [#allocation4], 1024  }
  0x68   :  { %1685 = vsyncadd [#allocation4], 4294966272 }
  0x69   :  { %1686 = dma.done.wait [#allocation7], 768  }
  0x6a   :  { %1687 = vsyncadd [#allocation7], 4294966528 }
  0x6b   :  { %1688 = dma.done.wait [#allocation10], 528  }
  0x6c   :  { %1689 = vsyncadd [#allocation10], 4294966768 }
  0x6d   :  { %1690 = dma.done.wait [#allocation13], 16  }
  0x6e   :  { %1691 = vsyncadd [#allocation13], 4294967280  ;;  %v1702_v0 = vmov 0.0|0.0   ;;  %vm1703_vm0 = vmmov 0   ;;  %v1704_v1 = vmov 0.0   ;;  %vm119_vm1 = vcmask 130048  }
  0x6f   :  { %1394 = vmatprep.subr.bf16.mxu1 %v1702_v0  ;;  %1299 = vmatprep.mubr.msk.f32.mxu1 %vm1703_vm0, %v1704_v1  ;;  %v110_v2 = vld [vmem:[#allocation6] sm:$0xff]  ;;  %v111_v3 = vld [vmem:[#allocation6 + $0x8] sm:$0xff]  ;;  %v257_v4 = vld [vmem:[#allocation8] sm:$0xff]  ;;  %s1705_s5 = smov 64   ;;  %s1706_s10 = smov 32   ;;  %vm262_vm2 = vcmask 261120  }
  0x70   :  { %v1390_v5 = vpack.c.bf16 %v111_v3, %v110_v2  ;;  %v258_v6 = vld [vmem:[#allocation8 + $0x8] sm:$0xff]  ;;  %v102_v7 = vld [vmem:[#allocation3] sm:$0xff]  ;;  %v260_v10 = vld [vmem:[#allocation8 + $0x18] sm:$0xff]  ;;  %s1707_s1 = smov [#allocation14]  }
  0x71   :  { %v1845_v8 = vpack.c.bf16 %v258_v6, %v257_v4  ;;  %1279 = vmatprep.mubr.msk.f32.mxu0 %vm119_vm1, %v102_v7  ;;  %v259_v9 = vld [vmem:[#allocation8 + $0x10] sm:$0xff]  ;;  %v103_v11 = vld [vmem:[#allocation3 + $0x8] sm:$0xff]  ;;  %v1867_v13 = vld [vmem:[#allocation9] ss:$0 sm:$0xff]  ;;  %s1182_s0 = sshll.u32 %s1707_s1, 4  ;;  %s1183_s0 = int_to_ptr.vmem [resolvable:$true] %s1182_s0 }
  0x72   :  { %1391 = vmatprep.subr.bf16.mxu0 %v1390_v5  ;;  %v1849_v12 = vpack.c.bf16 %v260_v10, %v259_v9  ;;  %v104_v48 = vld [vmem:[#allocation3 + $0x10] sm:$0xff]  ;;  %v105_v49 = vld [vmem:[#allocation3 + $0x18] sm:$0xff]  ;;  %v106_v50 = vld [vmem:[#allocation3 + $0x20] sm:$0xff]  ;;  %s1662_s21 = scalar_lea.vmem %s1183_s0, 128  ;;  %p1667_p7 = scmp.lt.s32.totalorder %s1183_s0, %s1183_s0 }
  0x73   :  { %1396 = vmatpush3.bf16.msra.mxu1 %v1845_v8  ;;  %1393 = vmatpush3.bf16.msra.mxu0 %v1390_v5  ;;  %v107_v51 = vld [vmem:[#allocation3 + $0x28] sm:$0xff]  ;;  %v108_v52 = vld [vmem:[#allocation3 + $0x30] sm:$0xff]  ;;  %v109_v53 = vld [vmem:[#allocation3 + $0x38] sm:$0xff]  ;;  %p1663_p6 = scmp.ne.s32.totalorder %s1183_s0, %s1662_s21  ;;  %p1668_p8 = scmp.lt.s32.totalorder %s1662_s21, %s1662_s21 }
  0x74   :  { %1397 = vmatprep.subr.bf16.mxu1 %v1702_v0  ;;  %1406 = vmatprep.subr.bf16.mxu0 %v1702_v0 }
  0x75   :  { %p1669_p9 = por %p1668_p8, %p1667_p7 }
  0x76   :  { %1280 = vmatmul.mubr.msk.f32.vlgmr.msra.gmra.mrb[0].mxu0 %vm119_vm1, %v103_v11 }
  0x77   :  { %1399 = vmatpush3.bf16.msra.mxu1 %v1849_v12  ;;  %1408 = vmatpush3.bf16.msra.mxu0 %v1845_v8  ;;  %p1670_p10 = pnand %p1669_p9, %p1663_p6 }
  0x78   :  { %1400 = vmatprep.subr.bf16.mxu1 %v1702_v0  ;;  %1409 = vmatprep.subr.bf16.mxu0 %v1702_v0 }
  0x79   :  { %1282 = vmatprep.mubr.msk.f32.mxu0 %vm119_vm1, %v104_v48 }
  0x7a   :  { %1300 = vmatmul.mubr.f32.vlgmr.msra.gmra.mrb[0].mxu1 %v1704_v1  ;;  %1283 = vmatmul.mubr.msk.f32.gmra.mrb[2].mxu0 %vm119_vm1, %v105_v49 }
  0x7b   :  { %1402 = vmatpush3.bf16.msra.mxu1 %v1845_v8  ;;  %1310 = vmatprep.mubr.msk.f32.mxu1 %vm1703_vm0, %v1704_v1 }
  0x7c   :  { %1403 = vmatprep.subr.bf16.mxu1 %v1702_v0  ;;  %1411 = vmatpush3.bf16.msra.mxu0 %v1849_v12 }
  0x7d   :  { %1418 = vmatprep.subr.bf16.mxu0 %v1702_v0  ;;  %1285 = vmatprep.mubr.msk.f32.mxu0 %vm119_vm1, %v106_v50 }
  0x7e   :  { %1286 = vmatmul.mubr.msk.f32.gmra.mrb[4].mxu0 %vm119_vm1, %v107_v51 }
  0x7f   :  { %1405 = vmatpush3.bf16.msra.mxu1 %v1849_v12  ;;  %1288 = vmatprep.mubr.msk.f32.mxu0 %vm119_vm1, %v108_v52 }
  0x80   :  { %1412 = vmatprep.subr.bf16.mxu1 %v1702_v0 }
  0x82   :  { %1289 = vmatmul.mubr.msk.f32.gmra.mrb[6].mxu0 %vm119_vm1, %v109_v53 }
  0x83   :  { %1321 = vmatprep.mubr.msk.f32.mxu0 %vm1703_vm0, %v1704_v1 }
 0x149   :  { %v1281_v14 = vpop.f32.mrb[0].mxu0 }
 0x14a   :  { %v210_v15 = vpop.f32.mrb[1].mxu0  ;;  %v216_v34 = vadd.f32 %v1281_v14, %v1867_v13 }
 0x14b   :  { %v211_v16 = vadd.f32 %v1867_v13, %v210_v15 }
 0x14d   :  { %v332_v17 = vpop.f32.mrb[0].mxu1  ;;  %v1284_v57 = vpop.f32.mrb[2].mxu0 }
 0x14e   :  { %v336_v18 = vadd.f32 %v332_v17, %v211_v16  ;;  %v1301_v19 = vpop.f32.mrb[1].mxu1  ;;  %v220_v58 = vpop.f32.mrb[3].mxu0 }
 0x14f   :  { %v221_v2 = vadd.f32 %v1867_v13, %v220_v58 }
 0x150   :  { %1462 = vtanh.f32 %v336_v18  ;;  %v1203_v21 = vmul.f32 -1.442695, %v336_v18 }
 0x151   :  { %v1894_v59 = vpop.f32.mrb[4].mxu0 }
 0x152   :  { %1464 = vpow2.f32 %v1203_v21  ;;  %v1896_v60 = vpop.f32.mrb[5].mxu0 }
 0x155   :  { %v1898_v61 = vpop.f32.mrb[6].mxu0 }
 0x156   :  { %v1900_v62 = vpop.f32.mrb[7].mxu0 }
 0x15a   :  { %v1463_v20 = vpop.eup %1462 }
 0x15b   :  { %346 = vrot.lane.b32.xlu0 %v1463_v20, %s1705_s5 }
 0x15c   :  { %v1465_v22 = vpop.eup %1464 }
 0x15d   :  { %v340_v23 = vadd.f32 1.0, %v1465_v22 }
 0x15f   :  { %1466 = vrcp.f32 %v340_v23  ;;  %v226_v23 = vadd.f32 %v1284_v57, %v1867_v13 }
 0x169   :  { %v1467_v24 = vpop.eup %1466 }
 0x16a   :  { %v344_v27 = vmul.f32 0.0, %v1467_v24 }
 0x1cd   :  { %v347_v25 = vpop.permute.xlu0 %346 }
 0x1ce   :  { %v349_v26 = vmul.f32 %v1467_v24, %v347_v25 }
 0x1d0   :  { %351 = vrot.lane.b32.xlu0 %v349_v26, %s1706_s10 }
 0x242   :  { %v352_v28 = vpop.permute.xlu0 %351 }
 0x243   :  { %v354_v29 = vadd.f32 %v352_v28, %v344_v27 }
 0x245   :  { %1468 = vtanh.f32 %v354_v29 }
 0x24f   :  { %v1469_v30 = vpop.eup %1468 }
 0x250   :  { %357 = vrot.lane.b32.xlu1 %v1469_v30, %s1705_s5 }
 0x2c2   :  { %v358_v31 = vpop.permute.xlu1 %357 }
 0x2c3   :  { %v360_v32 = vmul.f32 %v1467_v24, %v358_v31 }
 0x2c5   :  { %364 = vrot.lane.b32.xlu1 %v360_v32, %s1706_s10 }
 0x337   :  { %v365_v33 = vpop.permute.xlu1 %364 }
 0x338   :  { %1311 = vmatmul.mubr.msk.f32.vlgmr.msra.gmra.mrb[2].mxu1 %vm262_vm2, %v365_v33 }
 0x339   :  { %1414 = vmatpush3.bf16.msra.mxu1 %v1845_v8  ;;  %1332 = vmatprep.mubr.msk.f32.mxu1 %vm1703_vm0, %v1704_v1 }
 0x33a   :  { %1415 = vmatprep.subr.bf16.mxu1 %v1702_v0 }
 0x33d   :  { %1417 = vmatpush3.bf16.msra.mxu1 %v1849_v12 }
 0x33e   :  { %1424 = vmatprep.subr.bf16.mxu1 %v1702_v0 }
 0x40b   :  { %v434_v35 = vpop.f32.mrb[2].mxu1 }
 0x40c   :  { %v438_v36 = vadd.f32 %v434_v35, %v216_v34  ;;  %v1312_v37 = vpop.f32.mrb[3].mxu1 }
 0x40e   :  { %1470 = vtanh.f32 %v438_v36  ;;  %v1205_v39 = vmul.f32 -1.442695, %v438_v36 }
 0x410   :  { %1472 = vpow2.f32 %v1205_v39 }
 0x418   :  { %v1471_v38 = vpop.eup %1470 }
 0x419   :  { %448 = vrot.lane.b32.xlu0 %v1471_v38, %s1705_s5 }
 0x41a   :  { %v1473_v40 = vpop.eup %1472 }
 0x41b   :  { %v442_v41 = vadd.f32 1.0, %v1473_v40 }
 0x41d   :  { %1474 = vrcp.f32 %v442_v41  ;;  %v231_v41 = vadd.f32 %v1867_v13, %v1896_v60  ;;  %v236_v60 = vadd.f32 %v1894_v59, %v1867_v13 }
 0x427   :  { %v1475_v42 = vpop.eup %1474 }
 0x428   :  { %v446_v45 = vmul.f32 %v1475_v42, %v354_v29 }
 0x48b   :  { %v449_v43 = vpop.permute.xlu0 %448 }
 0x48c   :  { %v451_v44 = vmul.f32 %v1475_v42, %v449_v43 }
 0x48e   :  { %453 = vrot.lane.b32.xlu1 %v451_v44, %s1706_s10 }
 0x500   :  { %v454_v46 = vpop.permute.xlu1 %453 }
 0x501   :  { %v456_v47 = vadd.f32 %v454_v46, %v446_v45 }
 0x503   :  { %1476 = vtanh.f32 %v456_v47 }
 0x50d   :  { %v1477_v54 = vpop.eup %1476 }
 0x50e   :  { %459 = vrot.lane.b32.xlu0 %v1477_v54, %s1705_s5 }
 0x580   :  { %v460_v55 = vpop.permute.xlu0 %459 }
 0x581   :  { %v462_v56 = vmul.f32 %v1475_v42, %v460_v55 }
 0x583   :  { %466 = vrot.lane.b32.xlu1 %v462_v56, %s1706_s10 }
 0x5f5   :  { %v467_v63 = vpop.permute.xlu1 %466 }
 0x5f6   :  { %1322 = vmatmul.mubr.msk.f32.vlgmr.msra.gmra.mrb[8].mxu0 %vm262_vm2, %v467_v63 }
 0x5f7   :  { %1420 = vmatpush3.bf16.msra.mxu0 %v1845_v8  ;;  %1343 = vmatprep.mubr.msk.f32.mxu0 %vm1703_vm0, %v1704_v1 }
 0x5f8   :  { %1421 = vmatprep.subr.bf16.mxu0 %v1702_v0 }
 0x5fb   :  { %1423 = vmatpush3.bf16.msra.mxu0 %v1849_v12 }
 0x5fc   :  { %1430 = vmatprep.subr.bf16.mxu0 %v1702_v0 }
 0x6c9   :  { %v536_v3 = vpop.f32.mrb[8].mxu0 }
 0x6ca   :  { %v540_v4 = vadd.f32 %v536_v3, %v221_v2  ;;  %v1323_v5 = vpop.f32.mrb[9].mxu0 }
 0x6cc   :  { %1478 = vtanh.f32 %v540_v4  ;;  %v1207_v7 = vmul.f32 -1.442695, %v540_v4 }
 0x6ce   :  { %1480 = vpow2.f32 %v1207_v7 }
 0x6d6   :  { %v1479_v6 = vpop.eup %1478 }
 0x6d7   :  { %550 = vrot.lane.b32.xlu0 %v1479_v6, %s1705_s5 }
 0x6d8   :  { %v1481_v9 = vpop.eup %1480 }
 0x6d9   :  { %v544_v10 = vadd.f32 1.0, %v1481_v9 }
 0x6db   :  { %1482 = vrcp.f32 %v544_v10 }
 0x6e5   :  { %v1483_v11 = vpop.eup %1482 }
 0x6e6   :  { %v548_v16 = vmul.f32 %v1483_v11, %v456_v47 }
 0x749   :  { %v551_v14 = vpop.permute.xlu0 %550 }
 0x74a   :  { %v553_v15 = vmul.f32 %v1483_v11, %v551_v14 }
 0x74c   :  { %555 = vrot.lane.b32.xlu1 %v553_v15, %s1706_s10 }
 0x7be   :  { %v556_v17 = vpop.permute.xlu1 %555 }
 0x7bf   :  { %v558_v18 = vadd.f32 %v556_v17, %v548_v16 }
 0x7c1   :  { %1484 = vtanh.f32 %v558_v18 }
 0x7cb   :  { %v1485_v19 = vpop.eup %1484 }
 0x7cc   :  { %561 = vrot.lane.b32.xlu0 %v1485_v19, %s1705_s5 }
 0x83e   :  { %v562_v20 = vpop.permute.xlu0 %561 }
 0x83f   :  { %v564_v21 = vmul.f32 %v1483_v11, %v562_v20 }
 0x841   :  { %568 = vrot.lane.b32.xlu1 %v564_v21, %s1706_s10 }
 0x8b3   :  { %v569_v22 = vpop.permute.xlu1 %568 }
 0x8b4   :  { %1333 = vmatmul.mubr.msk.f32.vlgmr.msra.gmra.mrb[4].mxu1 %vm262_vm2, %v569_v22 }
 0x8b5   :  { %1426 = vmatpush3.bf16.msra.mxu1 %v1845_v8  ;;  %1354 = vmatprep.mubr.msk.f32.mxu1 %vm1703_vm0, %v1704_v1 }
 0x8b6   :  { %1427 = vmatprep.subr.bf16.mxu1 %v1702_v0 }
 0x8b9   :  { %1429 = vmatpush3.bf16.msra.mxu1 %v1849_v12 }
 0x8ba   :  { %1436 = vmatprep.subr.bf16.mxu1 %v1702_v0 }
 0x987   :  { %v638_v24 = vpop.f32.mrb[4].mxu1 }
 0x988   :  { %v642_v25 = vadd.f32 %v638_v24, %v226_v23  ;;  %v1334_v26 = vpop.f32.mrb[5].mxu1 }
 0x98a   :  { %1486 = vtanh.f32 %v642_v25  ;;  %v1209_v28 = vmul.f32 -1.442695, %v642_v25 }
 0x98c   :  { %1488 = vpow2.f32 %v1209_v28 }
 0x994   :  { %v1487_v27 = vpop.eup %1486 }
 0x995   :  { %652 = vrot.lane.b32.xlu0 %v1487_v27, %s1705_s5 }
 0x996   :  { %v1489_v29 = vpop.eup %1488 }
 0x997   :  { %v646_v30 = vadd.f32 1.0, %v1489_v29 }
 0x999   :  { %1490 = vrcp.f32 %v646_v30 }
 0x9a3   :  { %v1491_v31 = vpop.eup %1490 }
 0x9a4   :  { %v650_v34 = vmul.f32 %v1491_v31, %v558_v18  ;;  %v241_v18 = vadd.f32 %v1867_v13, %v1900_v62 }
 0xa07   :  { %v653_v32 = vpop.permute.xlu0 %652 }
 0xa08   :  { %v655_v33 = vmul.f32 %v1491_v31, %v653_v32 }
 0xa0a   :  { %657 = vrot.lane.b32.xlu1 %v655_v33, %s1706_s10 }
 0xa7c   :  { %v658_v35 = vpop.permute.xlu1 %657 }
 0xa7d   :  { %v660_v36 = vadd.f32 %v658_v35, %v650_v34  ;;  %v246_v34 = vadd.f32 %v1898_v61, %v1867_v13  ;;  %v1075_v61 = vld [vmem:[#allocation11] sm:$0xff] }
 0xa7f   :  { %1492 = vtanh.f32 %v660_v36 }
 0xa89   :  { %v1493_v37 = vpop.eup %1492 }
 0xa8a   :  { %663 = vrot.lane.b32.xlu0 %v1493_v37, %s1705_s5 }
 0xafc   :  { %v664_v38 = vpop.permute.xlu0 %663 }
 0xafd   :  { %v666_v39 = vmul.f32 %v1491_v31, %v664_v38 }
 0xaff   :  { %670 = vrot.lane.b32.xlu1 %v666_v39, %s1706_s10 }
 0xb71   :  { %v671_v40 = vpop.permute.xlu1 %670 }
 0xb72   :  { %1344 = vmatmul.mubr.msk.f32.vlgmr.msra.gmra.mrb[10].mxu0 %vm262_vm2, %v671_v40 }
 0xb73   :  { %1432 = vmatpush3.bf16.msra.mxu0 %v1845_v8  ;;  %1365 = vmatprep.mubr.msk.f32.mxu0 %vm1703_vm0, %v1704_v1 }
 0xb74   :  { %1433 = vmatprep.subr.bf16.mxu0 %v1702_v0 }
 0xb77   :  { %1435 = vmatpush3.bf16.msra.mxu0 %v1849_v12 }
 0xb78   :  { %1442 = vmatprep.subr.bf16.mxu0 %v1702_v0 }
 0xc45   :  { %v740_v42 = vpop.f32.mrb[10].mxu0 }
 0xc46   :  { %v744_v43 = vadd.f32 %v740_v42, %v231_v41  ;;  %v1345_v44 = vpop.f32.mrb[11].mxu0 }
 0xc48   :  { %1494 = vtanh.f32 %v744_v43  ;;  %v1211_v46 = vmul.f32 -1.442695, %v744_v43 }
 0xc4a   :  { %1496 = vpow2.f32 %v1211_v46 }
 0xc52   :  { %v1495_v45 = vpop.eup %1494 }
 0xc53   :  { %754 = vrot.lane.b32.xlu0 %v1495_v45, %s1705_s5 }
 0xc54   :  { %v1497_v47 = vpop.eup %1496 }
 0xc55   :  { %v748_v48 = vadd.f32 1.0, %v1497_v47  ;;  %v1076_v47 = vld [vmem:[#allocation11 + $0x8] sm:$0xff] }
 0xc57   :  { %1498 = vrcp.f32 %v748_v48  ;;  %v1077_v48 = vld [vmem:[#allocation11 + $0x10] sm:$0xff] }
 0xc61   :  { %v1499_v49 = vpop.eup %1498 }
 0xc62   :  { %v752_v52 = vmul.f32 %v1499_v49, %v660_v36 }
 0xcc5   :  { %v755_v50 = vpop.permute.xlu0 %754 }
 0xcc6   :  { %v757_v51 = vmul.f32 %v1499_v49, %v755_v50  ;;  %v1078_v50 = vld [vmem:[#allocation11 + $0x18] sm:$0xff] }
 0xcc8   :  { %759 = vrot.lane.b32.xlu1 %v757_v51, %s1706_s10  ;;  %v1446_v51 = vpack.c.bf16 %v1078_v50, %v1077_v48 }
 0xd3a   :  { %v760_v53 = vpop.permute.xlu1 %759 }
 0xd3b   :  { %v762_v54 = vadd.f32 %v760_v53, %v752_v52 }
 0xd3d   :  { %1500 = vtanh.f32 %v762_v54 }
 0xd47   :  { %v1501_v55 = vpop.eup %1500 }
 0xd48   :  { %765 = vrot.lane.b32.xlu0 %v1501_v55, %s1705_s5 }
 0xdba   :  { %v766_v56 = vpop.permute.xlu0 %765 }
 0xdbb   :  { %v768_v57 = vmul.f32 %v1499_v49, %v766_v56  ;;  %v1443_v49 = vpack.c.bf16 %v1076_v47, %v1075_v61  ;;  %v1161_v56 = vlaneseq }
 0xdbd   :  { %772 = vrot.lane.b32.xlu1 %v768_v57, %s1706_s10  ;;  %v1162_v57 = vand.u32 127, %v1161_v56 }
 0xdbf   :  { %vm1163_vm3 = vcmp.lt.s32.totalorder %v1162_v57, 2 }
 0xe2f   :  { %v773_v58 = vpop.permute.xlu1 %772 }
 0xe30   :  { %1355 = vmatmul.mubr.msk.f32.vlgmr.msra.gmra.mrb[6].mxu1 %vm262_vm2, %v773_v58  ;;  %v1218_v58 = vld [vmem:[#allocation12] ss:$0 sm:$0xff] }
 0xe31   :  { %1438 = vmatpush3.bf16.msra.mxu1 %v1845_v8  ;;  %1376 = vmatprep.mubr.msk.f32.mxu1 %vm1703_vm0, %v1704_v1 }
 0xe32   :  { %1439 = vmatprep.subr.bf16.mxu1 %v1702_v0 }
 0xe35   :  { %1441 = vmatpush3.bf16.msra.mxu1 %v1849_v12 }
 0xf03   :  { %v842_v63 = vpop.f32.mrb[6].mxu1 }
 0xf04   :  { %v846_v2 = vadd.f32 %v842_v63, %v236_v60  ;;  %v1356_v3 = vpop.f32.mrb[7].mxu1 }
 0xf06   :  { %1502 = vtanh.f32 %v846_v2  ;;  %v1213_v5 = vmul.f32 -1.442695, %v846_v2 }
 0xf08   :  { %1504 = vpow2.f32 %v1213_v5 }
 0xf10   :  { %v1503_v4 = vpop.eup %1502 }
 0xf11   :  { %856 = vrot.lane.b32.xlu0 %v1503_v4, %s1705_s5 }
 0xf12   :  { %v1505_v8 = vpop.eup %1504 }
 0xf13   :  { %v850_v6 = vadd.f32 1.0, %v1505_v8 }
 0xf15   :  { %1506 = vrcp.f32 %v850_v6 }
 0xf1f   :  { %v1507_v7 = vpop.eup %1506 }
 0xf20   :  { %v854_v12 = vmul.f32 %v1507_v7, %v762_v54 }
 0xf83   :  { %v857_v9 = vpop.permute.xlu0 %856 }
 0xf84   :  { %v859_v10 = vmul.f32 %v1507_v7, %v857_v9 }
 0xf86   :  { %861 = vrot.lane.b32.xlu1 %v859_v10, %s1706_s10 }
 0xff8   :  { %v862_v11 = vpop.permute.xlu1 %861 }
 0xff9   :  { %v864_v59 = vadd.f32 %v862_v11, %v854_v12 }
 0xffb   :  { %1508 = vtanh.f32 %v864_v59 }
0x1005   :  { %v1509_v14 = vpop.eup %1508 }
0x1006   :  { %867 = vrot.lane.b32.xlu0 %v1509_v14, %s1705_s5 }
0x1078   :  { %v868_v15 = vpop.permute.xlu0 %867 }
0x1079   :  { %v870_v16 = vmul.f32 %v1507_v7, %v868_v15 }
0x107b   :  { %874 = vrot.lane.b32.xlu1 %v870_v16, %s1706_s10 }
0x10ed   :  { %v875_v17 = vpop.permute.xlu1 %874 }
0x10ee   :  { %1366 = vmatmul.mubr.msk.f32.vlgmr.msra.gmra.mrb[12].mxu0 %vm262_vm2, %v875_v17 }
0x10ef   :  { %1387 = vmatprep.mubr.msk.f32.mxu0 %vm1703_vm0, %v1704_v1  ;;  %1444 = vmatpush3.bf16.msra.mxu0 %v1443_v49 }
0x10f0   :  { %1445 = vmatprep.subr.bf16.mxu0 %v1702_v0 }
0x10f3   :  { %1447 = vmatpush3.bf16.msra.mxu0 %v1446_v51 }
0x11c1   :  { %v944_v19 = vpop.f32.mrb[12].mxu0 }
0x11c2   :  { %v948_v20 = vadd.f32 %v944_v19, %v241_v18  ;;  %v1367_v21 = vpop.f32.mrb[13].mxu0 }
0x11c4   :  { %1510 = vtanh.f32 %v948_v20  ;;  %v1215_v23 = vmul.f32 -1.442695, %v948_v20 }
0x11c6   :  { %1512 = vpow2.f32 %v1215_v23 }
0x11ce   :  { %v1511_v22 = vpop.eup %1510 }
0x11cf   :  { %958 = vrot.lane.b32.xlu0 %v1511_v22, %s1705_s5 }
0x11d0   :  { %v1513_v24 = vpop.eup %1512 }
0x11d1   :  { %v952_v25 = vadd.f32 1.0, %v1513_v24 }
0x11d3   :  { %1514 = vrcp.f32 %v952_v25 }
0x11dd   :  { %v1515_v26 = vpop.eup %1514 }
0x11de   :  { %v956_v1 = vmul.f32 %v1515_v26, %v864_v59 }
0x1241   :  { %v959_v27 = vpop.permute.xlu0 %958 }
0x1242   :  { %v961_v28 = vmul.f32 %v1515_v26, %v959_v27 }
0x1244   :  { %963 = vrot.lane.b32.xlu1 %v961_v28, %s1706_s10 }
0x12b6   :  { %v964_v29 = vpop.permute.xlu1 %963 }
0x12b7   :  { %v966_v62 = vadd.f32 %v964_v29, %v956_v1 }
0x12b9   :  { %1516 = vtanh.f32 %v966_v62 }
0x12c3   :  { %v1517_v30 = vpop.eup %1516 }
0x12c4   :  { %969 = vrot.lane.b32.xlu0 %v1517_v30, %s1705_s5 }
0x1336   :  { %v970_v31 = vpop.permute.xlu0 %969 }
0x1337   :  { %v972_v32 = vmul.f32 %v1515_v26, %v970_v31 }
0x1339   :  { %976 = vrot.lane.b32.xlu1 %v972_v32, %s1706_s10 }
0x13ab   :  { %v977_v33 = vpop.permute.xlu1 %976 }
0x13ac   :  { %1377 = vmatmul.mubr.msk.f32.vlgmr.msra.gmra.mrb[8].mxu1 %vm262_vm2, %v977_v33 }
0x147f   :  { %v1046_v35 = vpop.f32.mrb[8].mxu1 }
0x1480   :  { %v1050_v36 = vadd.f32 %v1046_v35, %v246_v34  ;;  %v1378_v37 = vpop.f32.mrb[9].mxu1 }
0x1482   :  { %1518 = vtanh.f32 %v1050_v36  ;;  %v1217_v39 = vmul.f32 -1.442695, %v1050_v36 }
0x1484   :  { %1520 = vpow2.f32 %v1217_v39 }
0x148c   :  { %v1519_v38 = vpop.eup %1518 }
0x148d   :  { %1060 = vrot.lane.b32.xlu0 %v1519_v38, %s1705_s5 }
0x148e   :  { %v1521_v40 = vpop.eup %1520 }
0x148f   :  { %v1054_v41 = vadd.f32 1.0, %v1521_v40 }
0x1491   :  { %1522 = vrcp.f32 %v1054_v41 }
0x149b   :  { %v1523_v42 = vpop.eup %1522 }
0x149c   :  { %v1058_v45 = vmul.f32 %v1523_v42, %v966_v62 }
0x14ff   :  { %v1061_v43 = vpop.permute.xlu0 %1060 }
0x1500   :  { %v1063_v44 = vmul.f32 %v1523_v42, %v1061_v43 }
0x1502   :  { %1065 = vrot.lane.b32.xlu1 %v1063_v44, %s1706_s10 }
0x1574   :  { %v1066_v46 = vpop.permute.xlu1 %1065 }
0x1575   :  { %v1068_v13 = vadd.f32 %v1066_v46, %v1058_v45 }
0x1577   :  { %1524 = vtanh.f32 %v1068_v13 }
0x1581   :  { %v1525_v52 = vpop.eup %1524 }
0x1582   :  { %1071 = vrot.lane.b32.xlu0 %v1525_v52, %s1705_s5 }
0x15f4   :  { %v1072_v53 = vpop.permute.xlu0 %1071 }
0x15f5   :  { %v1074_v54 = vmul.f32 %v1523_v42, %v1072_v53 }
0x15f7   :  { %1087 = vrot.lane.b32.xlu1 %v1074_v54, %s1706_s10 }
0x1669   :  { %v1088_v55 = vpop.permute.xlu1 %1087 }
0x166a   :  { %1388 = vmatmul.mubr.msk.f32.vlgmr.msra.gmra.mrb[14].mxu0 %vm262_vm2, %v1088_v55 }
0x173d   :  { %v1157_v60 = vpop.f32.mrb[14].mxu0 }
0x173e   :  { %v1158_v63 = vadd.f32 %v1218_v58, %v1157_v60  ;;  %v1389_v2 = vpop.f32.mrb[15].mxu0 }
0x1740   :  { %v1164_v3 = vsel %vm1163_vm3, %v1158_v63, -inf }
0x1741   :  { %1165 = vmax.xlane.f32.xlu0 %v1164_v3 }
0x17ce   :  { %v1166_v0 = vpop.xlane.xlu0 %1165 }
0x17cf   :  { %v1167_v4 = vsub.f32 %v1164_v3, %v1166_v0 }
0x17d1   :  { %v1168_v5 = vmul.f32 1.442695, %v1167_v4 }
0x17d3   :  { %1526 = vpow2.f32 %v1168_v5 }
0x17dd   :  { %v1527_v8 = vpop.eup %1526 }
0x17de   :  { %1170 = vadd.xlane.f32.xlu1 %v1527_v8 }
0x186b   :  { %v1171_v6 = vpop.xlane.xlu1 %1170 }
0x186c   :  { %1528 = vlog2.f32 %v1171_v6 }
0x1876   :  { %v1529_v7 = vpop.eup %1528 }
0x1877   :  { %v1173_v9 = vmul.f32 0.6931472, %v1529_v7 }
0x1879   :  { %v1174_v10 = vsub.f32 %v1167_v4, %v1173_v9 }
0x187b   :  { %1175 = vst [vmem:[#allocation14] sm:$0xff] %v1174_v10 }
0x187c   :  { %1673 = shalt.err (!%p1670_p10)
}
0x187d   :  { %s1674_s25 = scalar_lea.hbm %s1987_s6, 128 }
0x187e   :  { %p1675_p11 = scmp.ne.s32.totalorder %s1987_s6, %s1674_s25  ;;  %p1678_p12 = scmp.lt.u32.totalorder %s1674_s25, %s1987_s6 }
0x1880   :  { %p1680_p13 = pnand %p1678_p12, %p1675_p11 }
0x1882   :  { %1683 = shalt.err (!%p1680_p13)
}
0x1883   :  { %1185 = dma.vmem_to_hbm [thread:$0]  %s1183_s0, 128, %s1987_s6, [#allocation5]  }
0x1884   :  { %1692 = dma.done.wait [#allocation5], 128  }
0x1885   :  { %1693 = vsyncadd [#allocation5], 4294967168 }
0x1886   :  { %1189 = vsyncpa [#allocation4], 1 }
0x1887   :  { %1190 = vsyncpa [#allocation7], 1 }
0x1888   :  { %1191 = vsyncpa [#allocation10], 1 }
0x1889   :  { %1192 = vsyncpa [#allocation13], 1 }
0x188a   :  { %1193 = vsyncpa [#allocation5], 1 }

</bundles_post_ra>
